<compile_context>
chip_gen: v7x
topology: tpu7x:2x2x1
jax: 0.10.0
libtpu: 0.0.40
codegen_flags: <defaults>
</compile_context>

<pallas_src>
import functools

import jax
import jax.numpy as jnp
from jax.experimental import pallas as pl
from jax.experimental.pallas import tpu as pltpu


def _round_up(x, m):
    return ((x + m - 1) // m) * m


# ----------------------------------------------------------------------------
# Kernels
# ----------------------------------------------------------------------------
def _actor_kernel_nobn(x_ref, w1_ref, b1_ref, w2_ref, b2_ref, w3_ref, b3_ref,
                       out_ref):
    """use_bn=False: whole forward for one row tile (weights VMEM-resident)."""
    h = jnp.dot(x_ref[...], w1_ref[...],
                preferred_element_type=jnp.float32) + b1_ref[...]
    h = jnp.maximum(h, 0.0)
    h = jnp.dot(h.astype(w2_ref.dtype), w2_ref[...],
                preferred_element_type=jnp.float32) + b2_ref[...]
    h = jnp.maximum(h, 0.0)
    h = jnp.dot(h.astype(w3_ref.dtype), w3_ref[...],
                preferred_element_type=jnp.float32) + b3_ref[...]
    out_ref[...] = jnp.tanh(h).astype(out_ref.dtype)


def _bn_stats1_kernel(nv_ref, x_ref, w1_ref, sum_ref, sq_ref, *, tile_rows):
    """Per-tile sum / sumsq of fc1 pre-activations (bias cancels under BN)."""
    row = (pl.program_id(0) * tile_rows
           + jax.lax.broadcasted_iota(jnp.int32, (tile_rows, 1), 0))
    valid = row < nv_ref[0]
    h1 = jnp.dot(x_ref[...], w1_ref[...], preferred_element_type=jnp.float32)
    hm = jnp.where(valid, h1, 0.0)
    sum_ref[...] = jnp.sum(hm, axis=0, keepdims=True)[None]
    sq_ref[...] = jnp.sum(hm * hm, axis=0, keepdims=True)[None]


def _bn_stats2_kernel(nv_ref, x_ref, w1_ref, sc1_ref, sh1_ref, w2_ref,
                      sum_ref, sq_ref, *, tile_rows):
    """Per-tile sum / sumsq of fc2 pre-activations (BN1 pre-fused as scale/shift)."""
    row = (pl.program_id(0) * tile_rows
           + jax.lax.broadcasted_iota(jnp.int32, (tile_rows, 1), 0))
    valid = row < nv_ref[0]
    h1 = jnp.dot(x_ref[...], w1_ref[...], preferred_element_type=jnp.float32)
    h1 = jnp.maximum(h1 * sc1_ref[...] + sh1_ref[...], 0.0)
    h2 = jnp.dot(h1.astype(w2_ref.dtype), w2_ref[...],
                 preferred_element_type=jnp.float32)
    hm = jnp.where(valid, h2, 0.0)
    sum_ref[...] = jnp.sum(hm, axis=0, keepdims=True)[None]
    sq_ref[...] = jnp.sum(hm * hm, axis=0, keepdims=True)[None]


def _bn_apply_kernel(x_ref, w1_ref, sc1_ref, sh1_ref, w2_ref, sc2_ref, sh2_ref,
                     w3_ref, b3_ref, out_ref):
    """Full forward with BN1/BN2 pre-folded into per-feature scale/shift."""
    h1 = jnp.dot(x_ref[...], w1_ref[...], preferred_element_type=jnp.float32)
    h1 = jnp.maximum(h1 * sc1_ref[...] + sh1_ref[...], 0.0)
    h2 = jnp.dot(h1.astype(w2_ref.dtype), w2_ref[...],
                 preferred_element_type=jnp.float32)
    h2 = jnp.maximum(h2 * sc2_ref[...] + sh2_ref[...], 0.0)
    h3 = jnp.dot(h2.astype(w3_ref.dtype), w3_ref[...],
                 preferred_element_type=jnp.float32) + b3_ref[...]
    out_ref[...] = jnp.tanh(h3).astype(out_ref.dtype)


# ----------------------------------------------------------------------------
# Wrapper
# ----------------------------------------------------------------------------
def _vmem_limit_bytes(tile_rows, state_size, f1p, f2p, action_size, in_bytes):
    """Size-derived VMEM limit (double-buffered blocks + f32 temporaries)."""
    db = 2
    x_blk = tile_rows * state_size * in_bytes * db
    out_blk = tile_rows * action_size * 4 * db
    weights = (state_size * f1p + f1p * f2p + f2p * action_size) * in_bytes * db
    vecs = 8 * max(f1p, f2p) * 4 * db
    acts = tile_rows * (f1p + f2p) * 4 * 3
    est = x_blk + out_blk + weights + vecs + acts + (4 << 20)
    return int(min(max(est, 16 << 20), 64 << 20))


@functools.partial(jax.jit, static_argnames=("use_bn", "tile_n",
                                             "compute_dtype", "hidden_align"))
def actor_qnetwork_forward(state, params, *, use_bn, tile_n=1024,
                           compute_dtype=jnp.bfloat16, hidden_align=128):
    """state: [N, state_size] -> actions [N, action_size] (float32)."""
    n, state_size = state.shape
    f1 = params["w1"].shape[1]
    f2 = params["w2"].shape[1]
    action_size = params["w3"].shape[1]

    # Pad hidden dims to lane-dense multiples of 128 (use 256 on v6e/v7x if
    # the real hidden sizes are large enough to benefit).
    f1p = _round_up(f1, hidden_align)
    f2p = _round_up(f2, hidden_align)

    def pad_cols(a, cols):
        return a if a.shape[1] == cols else jnp.pad(a, ((0, 0), (0, cols - a.shape[1])))

    def pad_rows(a, rows):
        return a if a.shape[0] == rows else jnp.pad(a, ((0, rows - a.shape[0]), (0, 0)))

    w1 = pad_cols(params["w1"], f1p).astype(compute_dtype)
    b1 = pad_cols(params["b1"], f1p)
    g1 = pad_cols(params["g1"], f1p)
    be1 = pad_cols(params["be1"], f1p)
    w2 = pad_cols(pad_rows(params["w2"], f1p), f2p).astype(compute_dtype)
    b2 = pad_cols(params["b2"], f2p)
    g2 = pad_cols(params["g2"], f2p)
    be2 = pad_cols(params["be2"], f2p)
    w3 = pad_rows(params["w3"], f2p).astype(compute_dtype)   # out cols unpadded
    b3 = params["b3"]

    x = state.astype(compute_dtype)

    # Row tiling: minimize batch padding while keeping sublane (16) alignment
    # (legal for both bf16 and f32 input blocks) and allowing several tiles
    # for pipelining / megacore when the batch is large.
    row_align = 16
    n_chunks = max(1, pl.cdiv(n, tile_n))
    tile_rows = _round_up(pl.cdiv(n, n_chunks), row_align)
    num_tiles = pl.cdiv(n, tile_rows)
    n_pad = num_tiles * tile_rows
    if n_pad != n:
        x = jnp.pad(x, ((0, n_pad - n), (0, 0)))

    in_bytes = jnp.dtype(compute_dtype).itemsize
    cparams = pltpu.CompilerParams(
        dimension_semantics=("parallel",),   # row tiles are independent
        vmem_limit_bytes=_vmem_limit_bytes(tile_rows, state_size, f1p, f2p,
                                           action_size, in_bytes))

    out_shape_act = jax.ShapeDtypeStruct((n_pad, action_size), jnp.float32)
    out_spec_act = pl.BlockSpec((tile_rows, action_size), lambda i: (i, 0))
    x_spec = pl.BlockSpec((tile_rows, state_size), lambda i: (i, 0))
    const = lambda i: (0, 0)

    if not use_bn:
        out = pl.pallas_call(
            _actor_kernel_nobn,
            out_shape=out_shape_act,
            grid_spec=pltpu.PrefetchScalarGridSpec(
                num_scalar_prefetch=0,
                grid=(num_tiles,),
                in_specs=[
                    x_spec,
                    pl.BlockSpec((state_size, f1p), const),
                    pl.BlockSpec((1, f1p), const),
                    pl.BlockSpec((f1p, f2p), const),
                    pl.BlockSpec((1, f2p), const),
                    pl.BlockSpec((f2p, action_size), const),
                    pl.BlockSpec((1, action_size), const),
                ],
                out_specs=out_spec_act),
            compiler_params=cparams,
        )(x, w1, b1, w2, b2, w3, b3)
        return out if n_pad == n else out[:n]

    # ---------------- use_bn=True: 3 parallel passes ----------------
    nv = jnp.array([n], jnp.int32)               # scalar-prefetch valid-row count
    x_spec_p = pl.BlockSpec((tile_rows, state_size), lambda i, _: (i, 0))
    const_p = lambda i, _: (0, 0)
    stat_spec1 = pl.BlockSpec((1, 1, f1p), lambda i, _: (i, 0, 0))
    stat_spec2 = pl.BlockSpec((1, 1, f2p), lambda i, _: (i, 0, 0))
    eps = jnp.float32(1e-5)
    inv_n = jnp.float32(1.0 / n)

    # Pass A: per-tile partial sums of fc1 pre-activations.
    s1, q1 = pl.pallas_call(
        functools.partial(_bn_stats1_kernel, tile_rows=tile_rows),
        out_shape=(jax.ShapeDtypeStruct((num_tiles, 1, f1p), jnp.float32),
                   jax.ShapeDtypeStruct((num_tiles, 1, f1p), jnp.float32)),
        grid_spec=pltpu.PrefetchScalarGridSpec(
            num_scalar_prefetch=1,
            grid=(num_tiles,),
            in_specs=[x_spec_p, pl.BlockSpec((state_size, f1p), const_p)],
            out_specs=(stat_spec1, stat_spec1)),
        compiler_params=cparams,
    )(nv, x, w1)

    # BN1 folded to scale/shift.  Single-pass variance (clamped); fc1 bias
    # cancels exactly under BatchNorm so it is dropped entirely.
    mean1 = jnp.sum(s1, axis=0) * inv_n                          # (1, f1p)
    var1 = jnp.maximum(jnp.sum(q1, axis=0) * inv_n - mean1 * mean1, 0.0)
    sc1 = g1 * jax.lax.rsqrt(var1 + eps)
    sh1 = be1 - mean1 * sc1

    # Pass B: per-tile partial sums of fc2 pre-activations.
    s2, q2 = pl.pallas_call(
        functools.partial(_bn_stats2_kernel, tile_rows=tile_rows),
        out_shape=(jax.ShapeDtypeStruct((num_tiles, 1, f2p), jnp.float32),
                   jax.ShapeDtypeStruct((num_tiles, 1, f2p), jnp.float32)),
        grid_spec=pltpu.PrefetchScalarGridSpec(
            num_scalar_prefetch=1,
            grid=(num_tiles,),
            in_specs=[x_spec_p,
                      pl.BlockSpec((state_size, f1p), const_p),
                      pl.BlockSpec((1, f1p), const_p),
                      pl.BlockSpec((1, f1p), const_p),
                      pl.BlockSpec((f1p, f2p), const_p)],
            out_specs=(stat_spec2, stat_spec2)),
        compiler_params=cparams,
    )(nv, x, w1, sc1, sh1, w2)

    mean2 = jnp.sum(s2, axis=0) * inv_n
    var2 = jnp.maximum(jnp.sum(q2, axis=0) * inv_n - mean2 * mean2, 0.0)
    sc2 = g2 * jax.lax.rsqrt(var2 + eps)
    sh2 = be2 - mean2 * sc2

    # Pass C: full forward with fused BN scale/shift, lane-exact output store.
    out = pl.pallas_call(
        _bn_apply_kernel,
        out_shape=out_shape_act,
        grid_spec=pltpu.PrefetchScalarGridSpec(
            num_scalar_prefetch=0,
            grid=(num_tiles,),
            in_specs=[
                x_spec,
                pl.BlockSpec((state_size, f1p), const),
                pl.BlockSpec((1, f1p), const),
                pl.BlockSpec((1, f1p), const),
                pl.BlockSpec((f1p, f2p), const),
                pl.BlockSpec((1, f2p), const),
                pl.BlockSpec((1, f2p), const),
                pl.BlockSpec((f2p, action_size), const),
                pl.BlockSpec((1, action_size), const),
            ],
            out_specs=out_spec_act),
        compiler_params=cparams,
    )(x, w1, sc1, sh1, w2, sc2, sh2, w3, b3)
    return out if n_pad == n else out[:n]


# ----------------------------------------------------------------------------
# Init (mirrors Actor_QNetwork.reset_parameters) and a pure-JAX reference
# ----------------------------------------------------------------------------
def init_params(key, state_size, action_size, fc1_units, fc2_units):
    """hidden_init uses weight.size(0) == out_features in PyTorch, so the
    uniform limit is 1/sqrt(out_features) — reproduced exactly.
    Weights are stored as [in, out] (transpose of torch's [out, in])."""
    k1, k2, k3 = jax.random.split(key, 3)
    lim1 = 1.0 / jnp.sqrt(jnp.float32(fc1_units))
    lim2 = 1.0 / jnp.sqrt(jnp.float32(fc2_units))
    return {
        "w1": jax.random.uniform(k1, (state_size, fc1_units), jnp.float32,
                                 minval=-lim1, maxval=lim1),
        "b1": jnp.full((1, fc1_units), 0.1, jnp.float32),
        "w2": jax.random.uniform(k2, (fc1_units, fc2_units), jnp.float32,
                                 minval=-lim2, maxval=lim2),
        "b2": jnp.full((1, fc2_units), 0.1, jnp.float32),
        "w3": jax.random.uniform(k3, (fc2_units, action_size), jnp.float32,
                                 minval=-0.003, maxval=0.003),
        "b3": jnp.full((1, action_size), 0.1, jnp.float32),
        "g1": jnp.ones((1, fc1_units), jnp.float32),
        "be1": jnp.zeros((1, fc1_units), jnp.float32),
        "g2": jnp.ones((1, fc2_units), jnp.float32),
        "be2": jnp.zeros((1, fc2_units), jnp.float32),
    }


def _reference_forward(state, params, use_bn):
    """Pure-JAX reference of the PyTorch forward (BN in training mode)."""
    eps = 1e-5

    def bn(h, g, be):
        mean = jnp.mean(h, axis=0, keepdims=True)
        var = jnp.mean((h - mean) ** 2, axis=0, keepdims=True)
        return (h - mean) / jnp.sqrt(var + eps) * g + be

    h = state @ params["w1"] + params["b1"]
    if use_bn:
        h = bn(h, params["g1"], params["be1"])
    h = jnp.maximum(h, 0.0)
    h = h @ params["w2"] + params["b2"]
    if use_bn:
        h = bn(h, params["g2"], params["be2"])
    h = jnp.maximum(h, 0.0)
    return jnp.tanh(h @ params["w3"] + params["b3"])


if __name__ == "__main__":
    state_size, action_size = 8, 4
    fc1_units, fc2_units = 32, 32

    key = jax.random.PRNGKey(0)
    kp, kx = jax.random.split(key)
    params = init_params(kp, state_size, action_size, fc1_units, fc2_units)

    checks = [
        # (batch, tile_n, compute_dtype, tolerance)
        (16, 1024, jnp.float32, 1e-2),    # single tile, f32 compute
        (200, 64, jnp.float32, 1e-2),     # multi-tile + masked padded rows
        (16, 1024, jnp.bfloat16, 5e-2),   # default bf16 compute path
    ]
    for batch, tile_n, cdtype, tol in checks:
        kx, sub = jax.random.split(kx)
        state = jax.random.normal(sub, (batch, state_size), jnp.float32)
        for use_bn in (True, False):
            out = actor_qnetwork_forward(state, params, use_bn=use_bn,
                                         tile_n=tile_n, compute_dtype=cdtype)
            jax.block_until_ready(out)
            ref = _reference_forward(state, params, use_bn)

            assert out.shape == (batch, action_size)
            assert bool(jnp.all(jnp.isfinite(out))), "non-finite output"
            assert bool(jnp.all(jnp.abs(out) <= 1.0)), "tanh output out of range"
            assert bool(jnp.allclose(out, ref, atol=tol, rtol=tol)), (
                f"mismatch use_bn={use_bn} batch={batch} dtype={cdtype}:\n"
                f"{out}\nvs\n{ref}")

    print("KERNEL_OK")
</pallas_src>

<mosaic_0001>
module attributes {stable_mosaic.version = 11 : i64} {
  func.func @_bn_stats1_kernel(%arg0: i32, %arg1: memref<1xi32, #tpu.memory_space<smem>>, %arg2: memref<16x8xf32, #tpu.memory_space<vmem>>, %arg3: memref<8x128xf32, #tpu.memory_space<vmem>>, %arg4: memref<1x1x128xf32, #tpu.memory_space<vmem>>, %arg5: memref<1x1x128xf32, #tpu.memory_space<vmem>>) attributes {dimension_semantics = [#tpu.dimension_semantics<parallel>], iteration_bounds = array<i64: 1>, scalar_prefetch = 1 : i64, scratch_operands = 0 : i64, tpu.core_type = #tpu.core_type<tc>, window_params = [{transform_indices = @transform_0, window_bounds = array<i64: 16, 8>}, {pipeline_mode = #tpu.pipeline_mode<synchronous>, transform_indices = @transform_1, window_bounds = array<i64: 8, 128>}, {transform_indices = @transform_2, window_bounds = array<i64: 1, 1, 128>}, {transform_indices = @transform_3, window_bounds = array<i64: 1, 1, 128>}]} {
    %c16_i32 = arith.constant 16 : i32
    %0 = arith.muli %arg0, %c16_i32 : i32
    %1 = tpu.iota {dimensions = array<i32: 0>} : vector<16x1xi32>
    %2 = vector.broadcast %0 : i32 to vector<16x1xi32>
    %3 = arith.addi %2, %1 : vector<16x1xi32>
    %c0 = arith.constant 0 : index
    %4 = memref.load %arg1[%c0] : memref<1xi32, #tpu.memory_space<smem>>
    %5 = vector.broadcast %4 : i32 to vector<16x1xi32>
    %6 = arith.cmpi slt, %3, %5 : vector<16x1xi32>
    %c0_0 = arith.constant 0 : index
    %c0_1 = arith.constant 0 : index
    %7 = vector.load %arg2[%c0_0, %c0_1] : memref<16x8xf32, #tpu.memory_space<vmem>>, vector<16x8xf32>
    %c0_2 = arith.constant 0 : index
    %c0_3 = arith.constant 0 : index
    %8 = vector.load %arg3[%c0_2, %c0_3] : memref<8x128xf32, #tpu.memory_space<vmem>>, vector<8x128xf32>
    %cst = arith.constant dense<0.000000e+00> : vector<16x128xf32>
    %9 = tpu.matmul %7, %8, %cst {dimension_numbers = #tpu.dot_dimension_numbers<[1], [0], [0], [1], [0, 0, 1, 1], [], []>} : vector<16x8xf32>, vector<8x128xf32>, vector<16x128xf32> -> vector<16x128xf32>
    %cst_4 = arith.constant 0.000000e+00 : f32
    %10 = vector.shape_cast %6 : vector<16x1xi1> to vector<16x1xi1>
    %11 = vector.broadcast %10 : vector<16x1xi1> to vector<16x128xi1>
    %12 = vector.broadcast %cst_4 : f32 to vector<16x128xf32>
    %13 = arith.select %11, %9, %12 : vector<16x128xi1>, vector<16x128xf32>
    %cst_5 = arith.constant dense<0.000000e+00> : vector<128xf32>
    %14 = vector.multi_reduction <add>, %13, %cst_5 [0] : vector<16x128xf32> to vector<128xf32>
    %15 = vector.shape_cast %14 : vector<128xf32> to vector<1x128xf32>
    %16 = vector.shape_cast %15 : vector<1x128xf32> to vector<1x1x128xf32>
    %c0_6 = arith.constant 0 : index
    %c0_7 = arith.constant 0 : index
    %c0_8 = arith.constant 0 : index
    %17 = vector.load %arg4[%c0_6, %c0_7, %c0_8] : memref<1x1x128xf32, #tpu.memory_space<vmem>>, vector<1x1x128xf32>
    tpu.vector_store %arg4[%c0_6, %c0_7, %c0_8], %16 {strides = array<i32>} : memref<1x1x128xf32, #tpu.memory_space<vmem>>, vector<1x1x128xf32>,
    %18 = arith.mulf %13, %13 : vector<16x128xf32>
    %cst_9 = arith.constant dense<0.000000e+00> : vector<128xf32>
    %19 = vector.multi_reduction <add>, %18, %cst_9 [0] : vector<16x128xf32> to vector<128xf32>
    %20 = vector.shape_cast %19 : vector<128xf32> to vector<1x128xf32>
    %21 = vector.shape_cast %20 : vector<1x128xf32> to vector<1x1x128xf32>
    %c0_10 = arith.constant 0 : index
    %c0_11 = arith.constant 0 : index
    %c0_12 = arith.constant 0 : index
    %22 = vector.load %arg5[%c0_10, %c0_11, %c0_12] : memref<1x1x128xf32, #tpu.memory_space<vmem>>, vector<1x1x128xf32>
    tpu.vector_store %arg5[%c0_10, %c0_11, %c0_12], %21 {strides = array<i32>} : memref<1x1x128xf32, #tpu.memory_space<vmem>>, vector<1x1x128xf32>,
    return
  }
  func.func @transform_0(%arg0: i32, %arg1: memref<1xi32, #tpu.memory_space<smem>>) -> (i32, i32) {
    %c0_i32 = arith.constant 0 : i32
    %c0_i32_0 = arith.constant 0 : i32
    return %arg0, %c0_i32 : i32, i32
  }
  func.func @transform_1(%arg0: i32, %arg1: memref<1xi32, #tpu.memory_space<smem>>) -> (i32, i32) {
    %c0_i32 = arith.constant 0 : i32
    %c0_i32_0 = arith.constant 0 : i32
    %c0_i32_1 = arith.constant 0 : i32
    return %c0_i32, %c0_i32_0 : i32, i32
  }
  func.func @transform_2(%arg0: i32, %arg1: memref<1xi32, #tpu.memory_space<smem>>) -> (i32, i32, i32) {
    %c0_i32 = arith.constant 0 : i32
    %c0_i32_0 = arith.constant 0 : i32
    %c0_i32_1 = arith.constant 0 : i32
    return %arg0, %c0_i32, %c0_i32_0 : i32, i32, i32
  }
  func.func @transform_3(%arg0: i32, %arg1: memref<1xi32, #tpu.memory_space<smem>>) -> (i32, i32, i32) {
    %c0_i32 = arith.constant 0 : i32
    %c0_i32_0 = arith.constant 0 : i32
    %c0_i32_1 = arith.constant 0 : i32
    return %arg0, %c0_i32, %c0_i32_0 : i32, i32, i32
  }
}

module attributes {stable_mosaic.version = 11 : i64} {
  func.func @_bn_stats2_kernel(%arg0: i32, %arg1: memref<1xi32, #tpu.memory_space<smem>>, %arg2: memref<16x8xf32, #tpu.memory_space<vmem>>, %arg3: memref<8x128xf32, #tpu.memory_space<vmem>>, %arg4: memref<1x128xf32, #tpu.memory_space<vmem>>, %arg5: memref<1x128xf32, #tpu.memory_space<vmem>>, %arg6: memref<128x128xf32, #tpu.memory_space<vmem>>, %arg7: memref<1x1x128xf32, #tpu.memory_space<vmem>>, %arg8: memref<1x1x128xf32, #tpu.memory_space<vmem>>) attributes {dimension_semantics = [#tpu.dimension_semantics<parallel>], iteration_bounds = array<i64: 1>, scalar_prefetch = 1 : i64, scratch_operands = 0 : i64, tpu.core_type = #tpu.core_type<tc>, window_params = [{transform_indices = @transform_0, window_bounds = array<i64: 16, 8>}, {pipeline_mode = #tpu.pipeline_mode<synchronous>, transform_indices = @transform_1, window_bounds = array<i64: 8, 128>}, {pipeline_mode = #tpu.pipeline_mode<synchronous>, transform_indices = @transform_2, window_bounds = array<i64: 1, 128>}, {pipeline_mode = #tpu.pipeline_mode<synchronous>, transform_indices = @transform_3, window_bounds = array<i64: 1, 128>}, {pipeline_mode = #tpu.pipeline_mode<synchronous>, transform_indices = @transform_4, window_bounds = array<i64: 128, 128>}, {transform_indices = @transform_5, window_bounds = array<i64: 1, 1, 128>}, {transform_indices = @transform_6, window_bounds = array<i64: 1, 1, 128>}]} {
    %c16_i32 = arith.constant 16 : i32
    %0 = arith.muli %arg0, %c16_i32 : i32
    %1 = tpu.iota {dimensions = array<i32: 0>} : vector<16x1xi32>
    %2 = vector.broadcast %0 : i32 to vector<16x1xi32>
    %3 = arith.addi %2, %1 : vector<16x1xi32>
    %c0 = arith.constant 0 : index
    %4 = memref.load %arg1[%c0] : memref<1xi32, #tpu.memory_space<smem>>
    %5 = vector.broadcast %4 : i32 to vector<16x1xi32>
    %6 = arith.cmpi slt, %3, %5 : vector<16x1xi32>
    %c0_0 = arith.constant 0 : index
    %c0_1 = arith.constant 0 : index
    %7 = vector.load %arg2[%c0_0, %c0_1] : memref<16x8xf32, #tpu.memory_space<vmem>>, vector<16x8xf32>
    %c0_2 = arith.constant 0 : index
    %c0_3 = arith.constant 0 : index
    %8 = vector.load %arg3[%c0_2, %c0_3] : memref<8x128xf32, #tpu.memory_space<vmem>>, vector<8x128xf32>
    %cst = arith.constant dense<0.000000e+00> : vector<16x128xf32>
    %9 = tpu.matmul %7, %8, %cst {dimension_numbers = #tpu.dot_dimension_numbers<[1], [0], [0], [1], [0, 0, 1, 1], [], []>} : vector<16x8xf32>, vector<8x128xf32>, vector<16x128xf32> -> vector<16x128xf32>
    %c0_4 = arith.constant 0 : index
    %c0_5 = arith.constant 0 : index
    %10 = vector.load %arg4[%c0_4, %c0_5] : memref<1x128xf32, #tpu.memory_space<vmem>>, vector<1x128xf32>
    %11 = vector.broadcast %10 : vector<1x128xf32> to vector<16x128xf32>
    %12 = arith.mulf %9, %11 : vector<16x128xf32>
    %c0_6 = arith.constant 0 : index
    %c0_7 = arith.constant 0 : index
    %13 = vector.load %arg5[%c0_6, %c0_7] : memref<1x128xf32, #tpu.memory_space<vmem>>, vector<1x128xf32>
    %14 = vector.broadcast %13 : vector<1x128xf32> to vector<16x128xf32>
    %15 = arith.addf %12, %14 : vector<16x128xf32>
    %cst_8 = arith.constant 0.000000e+00 : f32
    %16 = vector.broadcast %cst_8 : f32 to vector<16x128xf32>
    %17 = arith.maximumf %15, %16 : vector<16x128xf32>
    %c0_9 = arith.constant 0 : index
    %c0_10 = arith.constant 0 : index
    %18 = vector.load %arg6[%c0_9, %c0_10] : memref<128x128xf32, #tpu.memory_space<vmem>>, vector<128x128xf32>
    %cst_11 = arith.constant dense<0.000000e+00> : vector<16x128xf32>
    %19 = tpu.matmul %17, %18, %cst_11 {dimension_numbers = #tpu.dot_dimension_numbers<[1], [0], [0], [1], [0, 0, 1, 1], [], []>} : vector<16x128xf32>, vector<128x128xf32>, vector<16x128xf32> -> vector<16x128xf32>
    %cst_12 = arith.constant 0.000000e+00 : f32
    %20 = vector.shape_cast %6 : vector<16x1xi1> to vector<16x1xi1>
    %21 = vector.broadcast %20 : vector<16x1xi1> to vector<16x128xi1>
    %22 = vector.broadcast %cst_12 : f32 to vector<16x128xf32>
    %23 = arith.select %21, %19, %22 : vector<16x128xi1>, vector<16x128xf32>
    %cst_13 = arith.constant dense<0.000000e+00> : vector<128xf32>
    %24 = vector.multi_reduction <add>, %23, %cst_13 [0] : vector<16x128xf32> to vector<128xf32>
    %25 = vector.shape_cast %24 : vector<128xf32> to vector<1x128xf32>
    %26 = vector.shape_cast %25 : vector<1x128xf32> to vector<1x1x128xf32>
    %c0_14 = arith.constant 0 : index
    %c0_15 = arith.constant 0 : index
    %c0_16 = arith.constant 0 : index
    %27 = vector.load %arg7[%c0_14, %c0_15, %c0_16] : memref<1x1x128xf32, #tpu.memory_space<vmem>>, vector<1x1x128xf32>
    tpu.vector_store %arg7[%c0_14, %c0_15, %c0_16], %26 {strides = array<i32>} : memref<1x1x128xf32, #tpu.memory_space<vmem>>, vector<1x1x128xf32>,
    %28 = arith.mulf %23, %23 : vector<16x128xf32>
    %cst_17 = arith.constant dense<0.000000e+00> : vector<128xf32>
    %29 = vector.multi_reduction <add>, %28, %cst_17 [0] : vector<16x128xf32> to vector<128xf32>
    %30 = vector.shape_cast %29 : vector<128xf32> to vector<1x128xf32>
    %31 = vector.shape_cast %30 : vector<1x128xf32> to vector<1x1x128xf32>
    %c0_18 = arith.constant 0 : index
    %c0_19 = arith.constant 0 : index
    %c0_20 = arith.constant 0 : index
    %32 = vector.load %arg8[%c0_18, %c0_19, %c0_20] : memref<1x1x128xf32, #tpu.memory_space<vmem>>, vector<1x1x128xf32>
    tpu.vector_store %arg8[%c0_18, %c0_19, %c0_20], %31 {strides = array<i32>} : memref<1x1x128xf32, #tpu.memory_space<vmem>>, vector<1x1x128xf32>,
    return
  }
  func.func @transform_0(%arg0: i32, %arg1: memref<1xi32, #tpu.memory_space<smem>>) -> (i32, i32) {
    %c0_i32 = arith.constant 0 : i32
    %c0_i32_0 = arith.constant 0 : i32
    return %arg0, %c0_i32 : i32, i32
  }
  func.func @transform_1(%arg0: i32, %arg1: memref<1xi32, #tpu.memory_space<smem>>) -> (i32, i32) {
    %c0_i32 = arith.constant 0 : i32
    %c0_i32_0 = arith.constant 0 : i32
    %c0_i32_1 = arith.constant 0 : i32
    return %c0_i32, %c0_i32_0 : i32, i32
  }
  func.func @transform_2(%arg0: i32, %arg1: memref<1xi32, #tpu.memory_space<smem>>) -> (i32, i32) {
    %c0_i32 = arith.constant 0 : i32
    %c0_i32_0 = arith.constant 0 : i32
    %c0_i32_1 = arith.constant 0 : i32
    return %c0_i32, %c0_i32_0 : i32, i32
  }
  func.func @transform_3(%arg0: i32, %arg1: memref<1xi32, #tpu.memory_space<smem>>) -> (i32, i32) {
    %c0_i32 = arith.constant 0 : i32
    %c0_i32_0 = arith.constant 0 : i32
    %c0_i32_1 = arith.constant 0 : i32
    return %c0_i32, %c0_i32_0 : i32, i32
  }
  func.func @transform_4(%arg0: i32, %arg1: memref<1xi32, #tpu.memory_space<smem>>) -> (i32, i32) {
    %c0_i32 = arith.constant 0 : i32
    %c0_i32_0 = arith.constant 0 : i32
    %c0_i32_1 = arith.constant 0 : i32
    return %c0_i32, %c0_i32_0 : i32, i32
  }
  func.func @transform_5(%arg0: i32, %arg1: memref<1xi32, #tpu.memory_space<smem>>) -> (i32, i32, i32) {
    %c0_i32 = arith.constant 0 : i32
    %c0_i32_0 = arith.constant 0 : i32
    %c0_i32_1 = arith.constant 0 : i32
    return %arg0, %c0_i32, %c0_i32_0 : i32, i32, i32
  }
  func.func @transform_6(%arg0: i32, %arg1: memref<1xi32, #tpu.memory_space<smem>>) -> (i32, i32, i32) {
    %c0_i32 = arith.constant 0 : i32
    %c0_i32_0 = arith.constant 0 : i32
    %c0_i32_1 = arith.constant 0 : i32
    return %arg0, %c0_i32, %c0_i32_0 : i32, i32, i32
  }
}

module attributes {stable_mosaic.version = 11 : i64} {
  func.func @_bn_apply_kernel(%arg0: i32, %arg1: memref<16x8xf32, #tpu.memory_space<vmem>>, %arg2: memref<8x128xf32, #tpu.memory_space<vmem>>, %arg3: memref<1x128xf32, #tpu.memory_space<vmem>>, %arg4: memref<1x128xf32, #tpu.memory_space<vmem>>, %arg5: memref<128x128xf32, #tpu.memory_space<vmem>>, %arg6: memref<1x128xf32, #tpu.memory_space<vmem>>, %arg7: memref<1x128xf32, #tpu.memory_space<vmem>>, %arg8: memref<128x4xf32, #tpu.memory_space<vmem>>, %arg9: memref<1x4xf32, #tpu.memory_space<vmem>>, %arg10: memref<16x4xf32, #tpu.memory_space<vmem>>) attributes {dimension_semantics = [#tpu.dimension_semantics<parallel>], iteration_bounds = array<i64: 1>, scalar_prefetch = 0 : i64, scratch_operands = 0 : i64, tpu.core_type = #tpu.core_type<tc>, window_params = [{transform_indices = @transform_0, window_bounds = array<i64: 16, 8>}, {pipeline_mode = #tpu.pipeline_mode<synchronous>, transform_indices = @transform_1, window_bounds = array<i64: 8, 128>}, {pipeline_mode = #tpu.pipeline_mode<synchronous>, transform_indices = @transform_2, window_bounds = array<i64: 1, 128>}, {pipeline_mode = #tpu.pipeline_mode<synchronous>, transform_indices = @transform_3, window_bounds = array<i64: 1, 128>}, {pipeline_mode = #tpu.pipeline_mode<synchronous>, transform_indices = @transform_4, window_bounds = array<i64: 128, 128>}, {pipeline_mode = #tpu.pipeline_mode<synchronous>, transform_indices = @transform_5, window_bounds = array<i64: 1, 128>}, {pipeline_mode = #tpu.pipeline_mode<synchronous>, transform_indices = @transform_6, window_bounds = array<i64: 1, 128>}, {pipeline_mode = #tpu.pipeline_mode<synchronous>, transform_indices = @transform_7, window_bounds = array<i64: 128, 4>}, {pipeline_mode = #tpu.pipeline_mode<synchronous>, transform_indices = @transform_8, window_bounds = array<i64: 1, 4>}, {transform_indices = @transform_9, window_bounds = array<i64: 16, 4>}]} {
    %c0 = arith.constant 0 : index
    %c0_0 = arith.constant 0 : index
    %0 = vector.load %arg1[%c0, %c0_0] : memref<16x8xf32, #tpu.memory_space<vmem>>, vector<16x8xf32>
    %c0_1 = arith.constant 0 : index
    %c0_2 = arith.constant 0 : index
    %1 = vector.load %arg2[%c0_1, %c0_2] : memref<8x128xf32, #tpu.memory_space<vmem>>, vector<8x128xf32>
    %cst = arith.constant dense<0.000000e+00> : vector<16x128xf32>
    %2 = tpu.matmul %0, %1, %cst {dimension_numbers = #tpu.dot_dimension_numbers<[1], [0], [0], [1], [0, 0, 1, 1], [], []>} : vector<16x8xf32>, vector<8x128xf32>, vector<16x128xf32> -> vector<16x128xf32>
    %c0_3 = arith.constant 0 : index
    %c0_4 = arith.constant 0 : index
    %3 = vector.load %arg3[%c0_3, %c0_4] : memref<1x128xf32, #tpu.memory_space<vmem>>, vector<1x128xf32>
    %4 = vector.broadcast %3 : vector<1x128xf32> to vector<16x128xf32>
    %5 = arith.mulf %2, %4 : vector<16x128xf32>
    %c0_5 = arith.constant 0 : index
    %c0_6 = arith.constant 0 : index
    %6 = vector.load %arg4[%c0_5, %c0_6] : memref<1x128xf32, #tpu.memory_space<vmem>>, vector<1x128xf32>
    %7 = vector.broadcast %6 : vector<1x128xf32> to vector<16x128xf32>
    %8 = arith.addf %5, %7 : vector<16x128xf32>
    %cst_7 = arith.constant 0.000000e+00 : f32
    %9 = vector.broadcast %cst_7 : f32 to vector<16x128xf32>
    %10 = arith.maximumf %8, %9 : vector<16x128xf32>
    %c0_8 = arith.constant 0 : index
    %c0_9 = arith.constant 0 : index
    %11 = vector.load %arg5[%c0_8, %c0_9] : memref<128x128xf32, #tpu.memory_space<vmem>>, vector<128x128xf32>
    %cst_10 = arith.constant dense<0.000000e+00> : vector<16x128xf32>
    %12 = tpu.matmul %10, %11, %cst_10 {dimension_numbers = #tpu.dot_dimension_numbers<[1], [0], [0], [1], [0, 0, 1, 1], [], []>} : vector<16x128xf32>, vector<128x128xf32>, vector<16x128xf32> -> vector<16x128xf32>
    %c0_11 = arith.constant 0 : index
    %c0_12 = arith.constant 0 : index
    %13 = vector.load %arg6[%c0_11, %c0_12] : memref<1x128xf32, #tpu.memory_space<vmem>>, vector<1x128xf32>
    %14 = vector.broadcast %13 : vector<1x128xf32> to vector<16x128xf32>
    %15 = arith.mulf %12, %14 : vector<16x128xf32>
    %c0_13 = arith.constant 0 : index
    %c0_14 = arith.constant 0 : index
    %16 = vector.load %arg7[%c0_13, %c0_14] : memref<1x128xf32, #tpu.memory_space<vmem>>, vector<1x128xf32>
    %17 = vector.broadcast %16 : vector<1x128xf32> to vector<16x128xf32>
    %18 = arith.addf %15, %17 : vector<16x128xf32>
    %cst_15 = arith.constant 0.000000e+00 : f32
    %19 = vector.broadcast %cst_15 : f32 to vector<16x128xf32>
    %20 = arith.maximumf %18, %19 : vector<16x128xf32>
    %c0_16 = arith.constant 0 : index
    %c0_17 = arith.constant 0 : index
    %21 = vector.load %arg8[%c0_16, %c0_17] : memref<128x4xf32, #tpu.memory_space<vmem>>, vector<128x4xf32>
    %cst_18 = arith.constant dense<0.000000e+00> : vector<16x4xf32>
    %22 = tpu.matmul %20, %21, %cst_18 {dimension_numbers = #tpu.dot_dimension_numbers<[1], [0], [0], [1], [0, 0, 1, 1], [], []>} : vector<16x128xf32>, vector<128x4xf32>, vector<16x4xf32> -> vector<16x4xf32>
    %c0_19 = arith.constant 0 : index
    %c0_20 = arith.constant 0 : index
    %23 = vector.load %arg9[%c0_19, %c0_20] : memref<1x4xf32, #tpu.memory_space<vmem>>, vector<1x4xf32>
    %24 = vector.broadcast %23 : vector<1x4xf32> to vector<16x4xf32>
    %25 = arith.addf %22, %24 : vector<16x4xf32>
    %26 = math.tanh %25 : vector<16x4xf32>
    %c0_21 = arith.constant 0 : index
    %c0_22 = arith.constant 0 : index
    %27 = vector.load %arg10[%c0_21, %c0_22] : memref<16x4xf32, #tpu.memory_space<vmem>>, vector<16x4xf32>
    tpu.vector_store %arg10[%c0_21, %c0_22], %26 {strides = array<i32>} : memref<16x4xf32, #tpu.memory_space<vmem>>, vector<16x4xf32>,
    return
  }
  func.func @transform_0(%arg0: i32) -> (i32, i32) {
    %c0_i32 = arith.constant 0 : i32
    %c0_i32_0 = arith.constant 0 : i32
    return %arg0, %c0_i32 : i32, i32
  }
  func.func @transform_1(%arg0: i32) -> (i32, i32) {
    %c0_i32 = arith.constant 0 : i32
    %c0_i32_0 = arith.constant 0 : i32
    %c0_i32_1 = arith.constant 0 : i32
    return %c0_i32, %c0_i32_0 : i32, i32
  }
  func.func @transform_2(%arg0: i32) -> (i32, i32) {
    %c0_i32 = arith.constant 0 : i32
    %c0_i32_0 = arith.constant 0 : i32
    %c0_i32_1 = arith.constant 0 : i32
    return %c0_i32, %c0_i32_0 : i32, i32
  }
  func.func @transform_3(%arg0: i32) -> (i32, i32) {
    %c0_i32 = arith.constant 0 : i32
    %c0_i32_0 = arith.constant 0 : i32
    %c0_i32_1 = arith.constant 0 : i32
    return %c0_i32, %c0_i32_0 : i32, i32
  }
  func.func @transform_4(%arg0: i32) -> (i32, i32) {
    %c0_i32 = arith.constant 0 : i32
    %c0_i32_0 = arith.constant 0 : i32
    %c0_i32_1 = arith.constant 0 : i32
    return %c0_i32, %c0_i32_0 : i32, i32
  }
  func.func @transform_5(%arg0: i32) -> (i32, i32) {
    %c0_i32 = arith.constant 0 : i32
    %c0_i32_0 = arith.constant 0 : i32
    %c0_i32_1 = arith.constant 0 : i32
    return %c0_i32, %c0_i32_0 : i32, i32
  }
  func.func @transform_6(%arg0: i32) -> (i32, i32) {
    %c0_i32 = arith.constant 0 : i32
    %c0_i32_0 = arith.constant 0 : i32
    %c0_i32_1 = arith.constant 0 : i32
    return %c0_i32, %c0_i32_0 : i32, i32
  }
  func.func @transform_7(%arg0: i32) -> (i32, i32) {
    %c0_i32 = arith.constant 0 : i32
    %c0_i32_0 = arith.constant 0 : i32
    %c0_i32_1 = arith.constant 0 : i32
    return %c0_i32, %c0_i32_0 : i32, i32
  }
  func.func @transform_8(%arg0: i32) -> (i32, i32) {
    %c0_i32 = arith.constant 0 : i32
    %c0_i32_0 = arith.constant 0 : i32
    %c0_i32_1 = arith.constant 0 : i32
    return %c0_i32, %c0_i32_0 : i32, i32
  }
  func.func @transform_9(%arg0: i32) -> (i32, i32) {
    %c0_i32 = arith.constant 0 : i32
    %c0_i32_0 = arith.constant 0 : i32
    return %arg0, %c0_i32 : i32, i32
  }
}

</mosaic_0001>

<bundles_post_ra>
// kernel: actor_qnetwork_forward.3
= control target key start
LH: loop header
LB: loop body
LE: loop exit
PB: predicated region body
PF: predicated region fallthrough
CT: control target
= control target key end

     0   :  { %vm29_vm0 = vcmask 64512   ;;  %v16_v3 = vlaneseq  ;;  %s196_s2 = inlined_call_operand.vmem [shape: f32[8,128], index: 2, kind: input, shape index: {}]   ;;  %s197_s1 = inlined_call_operand.vmem [shape: f32[16,8], index: 1, kind: input, shape index: {}]   ;;  %s198_s0 = inlined_call_operand.<no memory space> [shape: s32[1], index: 0, kind: input, shape index: {}]   ;;  %s199_s3 = inlined_call_operand.vmem [shape: f32[1,1,128], index: 3, kind: output, shape index: {0}]   ;;  %s200_s4 = inlined_call_operand.vmem [shape: f32[1,1,128], index: 4, kind: output, shape index: {1}]  }
   0x1   :  { %v28_v0 = vld [vmem:[%s196_s2] sm:$0xff]  ;;  %v27_v2 = vld [vmem:[%s197_s1 + $0x8] sm:$0xff]  ;;  %v23_v6 = vstv %s198_s0 }
   0x2   :  { %v26_v1 = vld [vmem:[%s197_s1] sm:$0xff]  ;;  %148 = vmatprep.subr.mxu0 %v28_v0  ;;  %v17_v4 = vshrl.u32 %v16_v3, 7 }
   0x3   :  { %150 = vmatprep.mubr.msk.f32.mxu0 %vm29_vm0, %v26_v1  ;;  %149 = vmatpush3.msra.mxu0 %v28_v0 }
   0x4   :  { %151 = vmatmul.mubr.msk.f32.vlgmr.msra.gmra.mrb[0].mxu0 %vm29_vm0, %v27_v2  ;;  %v18_v5 = vadd.s32 8, %v17_v4  ;;  %vm24_vm2 = vcmp.lt.s32.totalorder %v17_v4, %v23_v6 }
   0x6   :  { %vm25_vm1 = vcmp.lt.s32.totalorder %v18_v5, %v23_v6 }
  0xd7   :  { %v152_v7 = vpop.f32.mrb[0].mxu0 }
  0xd8   :  { %v116_v8 = vsel %vm25_vm1, %v152_v7, 0.0  ;;  %v102_v9 = vpop.f32.mrb[1].mxu0 }
  0xd9   :  { %v126_v10 = vmul.f32 %v116_v8, %v116_v8  ;;  %v115_v11 = vsel %vm24_vm2, %v102_v9, 0.0 }
  0xda   :  { %v117_v12 = vadd.f32 %v116_v8, %v115_v11  ;;  %v125_v13 = vmul.f32 %v115_v11, %v115_v11 }
  0xdc   :  { %v118_v14 = vrot.slane %v117_v12, 4  ;;  %v127_v15 = vadd.f32 %v126_v10, %v125_v13 }
  0xde   :  { %v119_v16 = vadd.f32 %v118_v14, %v117_v12  ;;  %v128_v17 = vrot.slane %v127_v15, 4 }
  0xe0   :  { %v120_v18 = vrot.slane %v119_v16, 2  ;;  %v129_v19 = vadd.f32 %v128_v17, %v127_v15 }
  0xe2   :  { %v121_v20 = vadd.f32 %v120_v18, %v119_v16  ;;  %v130_v21 = vrot.slane %v129_v19, 2 }
  0xe4   :  { %v122_v22 = vrot.slane %v121_v20, 1  ;;  %v131_v23 = vadd.f32 %v130_v21, %v129_v19 }
  0xe6   :  { %v123_v24 = vadd.f32 %v122_v22, %v121_v20  ;;  %v132_v25 = vrot.slane %v131_v23, 1 }
  0xe8   :  { %124 = vst [vmem:[%s199_s3] sm:$0x1] %v123_v24  ;;  %v133_v26 = vadd.f32 %v132_v25, %v131_v23 }
  0xea   :  { %134 = vst [vmem:[%s200_s4] sm:$0x1] %v133_v26 }

// kernel: actor_qnetwork_forward.4
= control target key start
LH: loop header
LB: loop body
LE: loop exit
PB: predicated region body
PF: predicated region fallthrough
CT: control target
= control target key end

     0   :  { %vm38_vm0 = vcmask 64512   ;;  %v25_v37 = vlaneseq  ;;  %s472_s2 = inlined_call_operand.vmem [shape: f32[8,128], index: 2, kind: input, shape index: {}]   ;;  %s473_s1 = inlined_call_operand.vmem [shape: f32[16,8], index: 1, kind: input, shape index: {}]   ;;  %s474_s5 = inlined_call_operand.vmem [shape: f32[128,128], index: 5, kind: input, shape index: {}]   ;;  %s475_s3 = inlined_call_operand.vmem [shape: f32[1,128], index: 3, kind: input, shape index: {}]   ;;  %s476_s4 = inlined_call_operand.vmem [shape: f32[1,128], index: 4, kind: input, shape index: {}]   ;;  %s477_s0 = inlined_call_operand.<no memory space> [shape: s32[1], index: 0, kind: input, shape index: {}]   ;;  %s478_s6 = inlined_call_operand.vmem [shape: f32[1,1,128], index: 6, kind: output, shape index: {0}]   ;;  %s479_s7 = inlined_call_operand.vmem [shape: f32[1,1,128], index: 7, kind: output, shape index: {1}]  }
   0x1   :  { %v37_v0 = vld [vmem:[%s472_s2] sm:$0xff]  ;;  %v36_v2 = vld [vmem:[%s473_s1 + $0x8] sm:$0xff]  ;;  %v142_v5 = vld [vmem:[%s474_s5 + $0x10] sm:$0xff]  ;;  %v32_v40 = vstv %s477_s0 }
   0x2   :  { %v35_v1 = vld [vmem:[%s473_s1] sm:$0xff]  ;;  %288 = vmatprep.subr.mxu0 %v37_v0  ;;  %v141_v4 = vld [vmem:[%s474_s5 + $0x8] sm:$0xff]  ;;  %v143_v7 = vld [vmem:[%s474_s5 + $0x18] sm:$0xff]  ;;  %v26_v38 = vshrl.u32 %v25_v37, 7 }
   0x3   :  { %290 = vmatprep.mubr.msk.f32.mxu0 %vm38_vm0, %v35_v1  ;;  %v140_v3 = vld [vmem:[%s474_s5] sm:$0xff]  ;;  %289 = vmatpush3.msra.mxu0 %v37_v0  ;;  %v332_v8 = vpack.c.bf16 %v143_v7, %v142_v5  ;;  %v145_v10 = vld [vmem:[%s474_s5 + $0x28] sm:$0xff]  ;;  %v146_v12 = vld [vmem:[%s474_s5 + $0x30] sm:$0xff] }
   0x4   :  { %v328_v6 = vpack.c.bf16 %v141_v4, %v140_v3  ;;  %291 = vmatmul.mubr.msk.f32.vlgmr.msra.gmra.mrb[0].mxu0 %vm38_vm0, %v36_v2  ;;  %v144_v9 = vld [vmem:[%s474_s5 + $0x20] sm:$0xff]  ;;  %v147_v13 = vld [vmem:[%s474_s5 + $0x38] sm:$0xff]  ;;  %v149_v16 = vld [vmem:[%s474_s5 + $0x48] sm:$0xff]  ;;  %v27_v39 = vadd.s32 8, %v26_v38  ;;  %vm33_vm2 = vcmp.lt.s32.totalorder %v26_v38, %v32_v40 }
   0x5   :  { %v336_v11 = vpack.c.bf16 %v145_v10, %v144_v9  ;;  %v340_v14 = vpack.c.bf16 %v147_v13, %v146_v12  ;;  %v148_v15 = vld [vmem:[%s474_s5 + $0x40] sm:$0xff]  ;;  %v150_v18 = vld [vmem:[%s474_s5 + $0x50] sm:$0xff]  ;;  %v151_v19 = vld [vmem:[%s474_s5 + $0x58] sm:$0xff] }
   0x6   :  { %329 = vmatprep.subr.bf16.mxu1 %v328_v6  ;;  %v344_v17 = vpack.c.bf16 %v149_v16, %v148_v15  ;;  %v348_v20 = vpack.c.bf16 %v151_v19, %v150_v18  ;;  %v152_v21 = vld [vmem:[%s474_s5 + $0x60] sm:$0xff]  ;;  %v153_v22 = vld [vmem:[%s474_s5 + $0x68] sm:$0xff]  ;;  %v154_v24 = vld [vmem:[%s474_s5 + $0x70] sm:$0xff]  ;;  %vm34_vm1 = vcmp.lt.s32.totalorder %v27_v39, %v32_v40 }
   0x7   :  { %331 = vmatpush3.bf16.msra.mxu1 %v328_v6  ;;  %v352_v23 = vpack.c.bf16 %v153_v22, %v152_v21  ;;  %v155_v25 = vld [vmem:[%s474_s5 + $0x78] sm:$0xff]  ;;  %v265_v27 = vld [vmem:[%s475_s3] ss:$0 sm:$0xff] }
   0x8   :  { %333 = vmatprep.subr.bf16.mxu1 %v332_v8  ;;  %v356_v26 = vpack.c.bf16 %v155_v25, %v154_v24  ;;  %v266_v29 = vld [vmem:[%s476_s4] ss:$0 sm:$0xff] }
   0xb   :  { %335 = vmatpush3.bf16.msra.mxu1 %v332_v8 }
   0xc   :  { %337 = vmatprep.subr.bf16.mxu1 %v336_v11 }
   0xf   :  { %339 = vmatpush3.bf16.msra.mxu1 %v336_v11 }
  0x10   :  { %341 = vmatprep.subr.bf16.mxu1 %v340_v14 }
  0x13   :  { %343 = vmatpush3.bf16.msra.mxu1 %v340_v14 }
  0x14   :  { %345 = vmatprep.subr.bf16.mxu1 %v344_v17 }
  0x17   :  { %347 = vmatpush3.bf16.msra.mxu1 %v344_v17 }
  0x18   :  { %349 = vmatprep.subr.bf16.mxu1 %v348_v20 }
  0x1b   :  { %351 = vmatpush3.bf16.msra.mxu1 %v348_v20 }
  0x1c   :  { %353 = vmatprep.subr.bf16.mxu1 %v352_v23 }
  0x1f   :  { %355 = vmatpush3.bf16.msra.mxu1 %v352_v23 }
  0x20   :  { %357 = vmatprep.subr.bf16.mxu1 %v356_v26 }
  0x23   :  { %359 = vmatpush3.bf16.msra.mxu1 %v356_v26 }
  0xd7   :  { %v292_v28 = vpop.f32.mrb[0].mxu0 }
  0xd8   :  { %v128_v30 = vmul.f32 %v292_v28, %v265_v27  ;;  %v111_v31 = vpop.f32.mrb[1].mxu0 }
  0xd9   :  { %v127_v32 = vmul.f32 %v265_v27, %v111_v31 }
  0xda   :  { %v137_v33 = vadd.f32 %v266_v29, %v128_v30 }
  0xdb   :  { %v136_v34 = vadd.f32 %v266_v29, %v127_v32 }
  0xdc   :  { %v139_v36 = vmax.f32 %v137_v33, 0.0 }
  0xdd   :  { %v138_v35 = vmax.f32 %v136_v34, 0.0 }
  0xdf   :  { %325 = vmatprep.mubr.f32.mxu1 %v138_v35 }
  0xe0   :  { %326 = vmatmul.mubr.f32.vlgmr.msra.gmra.mrb[0].mxu1 %v139_v36 }
 0x1b3   :  { %v327_v41 = vpop.f32.mrb[0].mxu1 }
 0x1b4   :  { %v236_v42 = vsel %vm34_vm1, %v327_v41, 0.0  ;;  %v222_v43 = vpop.f32.mrb[1].mxu1 }
 0x1b5   :  { %v246_v44 = vmul.f32 %v236_v42, %v236_v42  ;;  %v235_v45 = vsel %vm33_vm2, %v222_v43, 0.0 }
 0x1b6   :  { %v237_v46 = vadd.f32 %v236_v42, %v235_v45  ;;  %v245_v47 = vmul.f32 %v235_v45, %v235_v45 }
 0x1b8   :  { %v238_v48 = vrot.slane %v237_v46, 4  ;;  %v247_v49 = vadd.f32 %v246_v44, %v245_v47 }
 0x1ba   :  { %v239_v50 = vadd.f32 %v238_v48, %v237_v46  ;;  %v248_v51 = vrot.slane %v247_v49, 4 }
 0x1bc   :  { %v240_v52 = vrot.slane %v239_v50, 2  ;;  %v249_v53 = vadd.f32 %v248_v51, %v247_v49 }
 0x1be   :  { %v241_v54 = vadd.f32 %v240_v52, %v239_v50  ;;  %v250_v55 = vrot.slane %v249_v53, 2 }
 0x1c0   :  { %v242_v56 = vrot.slane %v241_v54, 1  ;;  %v251_v57 = vadd.f32 %v250_v55, %v249_v53 }
 0x1c2   :  { %v243_v58 = vadd.f32 %v242_v56, %v241_v54  ;;  %v252_v59 = vrot.slane %v251_v57, 1 }
 0x1c4   :  { %244 = vst [vmem:[%s478_s6] sm:$0x1] %v243_v58  ;;  %v253_v60 = vadd.f32 %v252_v59, %v251_v57 }
 0x1c6   :  { %254 = vst [vmem:[%s479_s7] sm:$0x1] %v253_v60 }

// kernel: actor_qnetwork_forward.5
= control target key start
LH: loop header
LB: loop body
LE: loop exit
PB: predicated region body
PF: predicated region fallthrough
CT: control target
= control target key end

     0   :  { %vm35_vm0 = vcmask 64512   ;;  %vm348_vm1 = vcmask 31744   ;;  %s720_s1 = inlined_call_operand.vmem [shape: f32[8,128], index: 1, kind: input, shape index: {}]   ;;  %s721_s0 = inlined_call_operand.vmem [shape: f32[16,8], index: 0, kind: input, shape index: {}]   ;;  %s722_s4 = inlined_call_operand.vmem [shape: f32[128,128], index: 4, kind: input, shape index: {}]   ;;  %s723_s7 = inlined_call_operand.vmem [shape: f32[128,4], index: 7, kind: input, shape index: {}]   ;;  %s724_s2 = inlined_call_operand.vmem [shape: f32[1,128], index: 2, kind: input, shape index: {}]   ;;  %s725_s3 = inlined_call_operand.vmem [shape: f32[1,128], index: 3, kind: input, shape index: {}]   ;;  %s726_s5 = inlined_call_operand.vmem [shape: f32[1,128], index: 5, kind: input, shape index: {}]   ;;  %s727_s6 = inlined_call_operand.vmem [shape: f32[1,128], index: 6, kind: input, shape index: {}]   ;;  %s728_s8 = inlined_call_operand.vmem [shape: f32[1,4], index: 8, kind: input, shape index: {}]   ;;  %s729_s9 = inlined_call_operand.vmem [shape: f32[16,4], index: 9, kind: output, shape index: {}]  }
   0x1   :  { %v34_v0 = vld [vmem:[%s720_s1] sm:$0xff]  ;;  %v33_v2 = vld [vmem:[%s721_s0 + $0x8] sm:$0xff]  ;;  %v139_v5 = vld [vmem:[%s722_s4 + $0x10] sm:$0xff] }
   0x2   :  { %v32_v1 = vld [vmem:[%s721_s0] sm:$0xff]  ;;  %401 = vmatprep.subr.mxu0 %v34_v0  ;;  %v138_v4 = vld [vmem:[%s722_s4 + $0x8] sm:$0xff]  ;;  %v140_v7 = vld [vmem:[%s722_s4 + $0x18] sm:$0xff] }
   0x3   :  { %403 = vmatprep.mubr.msk.f32.mxu0 %vm35_vm0, %v32_v1  ;;  %v137_v3 = vld [vmem:[%s722_s4] sm:$0xff]  ;;  %402 = vmatpush3.msra.mxu0 %v34_v0  ;;  %v480_v8 = vpack.c.bf16 %v140_v7, %v139_v5  ;;  %v142_v10 = vld [vmem:[%s722_s4 + $0x28] sm:$0xff]  ;;  %v143_v12 = vld [vmem:[%s722_s4 + $0x30] sm:$0xff] }
   0x4   :  { %v476_v6 = vpack.c.bf16 %v138_v4, %v137_v3  ;;  %404 = vmatmul.mubr.msk.f32.vlgmr.msra.gmra.mrb[0].mxu0 %vm35_vm0, %v33_v2  ;;  %v141_v9 = vld [vmem:[%s722_s4 + $0x20] sm:$0xff]  ;;  %v144_v13 = vld [vmem:[%s722_s4 + $0x38] sm:$0xff]  ;;  %v146_v16 = vld [vmem:[%s722_s4 + $0x48] sm:$0xff] }
   0x5   :  { %v484_v11 = vpack.c.bf16 %v142_v10, %v141_v9  ;;  %v488_v14 = vpack.c.bf16 %v144_v13, %v143_v12  ;;  %v145_v15 = vld [vmem:[%s722_s4 + $0x40] sm:$0xff]  ;;  %v147_v18 = vld [vmem:[%s722_s4 + $0x50] sm:$0xff]  ;;  %v148_v19 = vld [vmem:[%s722_s4 + $0x58] sm:$0xff] }
   0x6   :  { %477 = vmatprep.subr.bf16.mxu1 %v476_v6  ;;  %v492_v17 = vpack.c.bf16 %v146_v16, %v145_v15  ;;  %v496_v20 = vpack.c.bf16 %v148_v19, %v147_v18  ;;  %v149_v21 = vld [vmem:[%s722_s4 + $0x60] sm:$0xff]  ;;  %v150_v22 = vld [vmem:[%s722_s4 + $0x68] sm:$0xff]  ;;  %v151_v24 = vld [vmem:[%s722_s4 + $0x70] sm:$0xff] }
   0x7   :  { %479 = vmatpush3.bf16.msra.mxu1 %v476_v6  ;;  %v500_v23 = vpack.c.bf16 %v150_v22, %v149_v21  ;;  %v152_v25 = vld [vmem:[%s722_s4 + $0x78] sm:$0xff]  ;;  %v248_v27 = vld [vmem:[%s723_s7] sm:$0xff]  ;;  %v249_v28 = vld [vmem:[%s723_s7 + $0x8] sm:$0xff] }
   0x8   :  { %481 = vmatprep.subr.bf16.mxu1 %v480_v8  ;;  %v504_v26 = vpack.c.bf16 %v152_v25, %v151_v24  ;;  %v250_v29 = vld [vmem:[%s723_s7 + $0x10] sm:$0xff]  ;;  %v508_v30 = vpack.c.bf16 %v249_v28, %v248_v27  ;;  %v251_v31 = vld [vmem:[%s723_s7 + $0x18] sm:$0xff]  ;;  %v252_v33 = vld [vmem:[%s723_s7 + $0x20] sm:$0xff] }
   0x9   :  { %v512_v32 = vpack.c.bf16 %v251_v31, %v250_v29  ;;  %v253_v34 = vld [vmem:[%s723_s7 + $0x28] sm:$0xff]  ;;  %v254_v36 = vld [vmem:[%s723_s7 + $0x30] sm:$0xff]  ;;  %v255_v37 = vld [vmem:[%s723_s7 + $0x38] sm:$0xff] }
   0xa   :  { %509 = vmatprep.subr.bf16.mxu0 %v508_v30  ;;  %v516_v35 = vpack.c.bf16 %v253_v34, %v252_v33  ;;  %v520_v38 = vpack.c.bf16 %v255_v37, %v254_v36  ;;  %v256_v39 = vld [vmem:[%s723_s7 + $0x40] sm:$0xff]  ;;  %v257_v40 = vld [vmem:[%s723_s7 + $0x48] sm:$0xff]  ;;  %v258_v42 = vld [vmem:[%s723_s7 + $0x50] sm:$0xff] }
   0xb   :  { %483 = vmatpush3.bf16.msra.mxu1 %v480_v8  ;;  %511 = vmatpush3.bf16.msra.mxu0 %v508_v30  ;;  %v524_v41 = vpack.c.bf16 %v257_v40, %v256_v39  ;;  %v259_v43 = vld [vmem:[%s723_s7 + $0x58] sm:$0xff]  ;;  %v357_v45 = vld [vmem:[%s724_s2] ss:$0 sm:$0xff]  ;;  %v261_v56 = vld [vmem:[%s723_s7 + $0x68] sm:$0xff] }
   0xc   :  { %485 = vmatprep.subr.bf16.mxu1 %v484_v11  ;;  %513 = vmatprep.subr.bf16.mxu0 %v512_v32  ;;  %v528_v44 = vpack.c.bf16 %v259_v43, %v258_v42  ;;  %v358_v47 = vld [vmem:[%s725_s3] ss:$0 sm:$0xff]  ;;  %v262_v58 = vld [vmem:[%s723_s7 + $0x70] sm:$0xff]  ;;  %v263_v59 = vld [vmem:[%s723_s7 + $0x78] sm:$0xff] }
   0xd   :  { %v260_v55 = vld [vmem:[%s723_s7 + $0x60] sm:$0xff]  ;;  %v536_v60 = vpack.c.bf16 %v263_v59, %v262_v58 }
   0xe   :  { %v532_v57 = vpack.c.bf16 %v261_v56, %v260_v55  ;;  %v359_v61 = vld [vmem:[%s726_s5] ss:$0 sm:$0xff] }
   0xf   :  { %487 = vmatpush3.bf16.msra.mxu1 %v484_v11  ;;  %515 = vmatpush3.bf16.msra.mxu0 %v512_v32  ;;  %v360_v63 = vld [vmem:[%s727_s6] ss:$0 sm:$0xff] }
  0x10   :  { %489 = vmatprep.subr.bf16.mxu1 %v488_v14  ;;  %517 = vmatprep.subr.bf16.mxu0 %v516_v35  ;;  %v361_v7 = vld [vmem:[%s728_s8] ss:$0 sm:$0xff] }
  0x13   :  { %491 = vmatpush3.bf16.msra.mxu1 %v488_v14  ;;  %519 = vmatpush3.bf16.msra.mxu0 %v516_v35 }
  0x14   :  { %493 = vmatprep.subr.bf16.mxu1 %v492_v17  ;;  %521 = vmatprep.subr.bf16.mxu0 %v520_v38 }
  0x17   :  { %495 = vmatpush3.bf16.msra.mxu1 %v492_v17  ;;  %523 = vmatpush3.bf16.msra.mxu0 %v520_v38 }
  0x18   :  { %497 = vmatprep.subr.bf16.mxu1 %v496_v20  ;;  %525 = vmatprep.subr.bf16.mxu0 %v524_v41 }
  0x1b   :  { %499 = vmatpush3.bf16.msra.mxu1 %v496_v20  ;;  %527 = vmatpush3.bf16.msra.mxu0 %v524_v41 }
  0x1c   :  { %501 = vmatprep.subr.bf16.mxu1 %v500_v23  ;;  %529 = vmatprep.subr.bf16.mxu0 %v528_v44 }
  0x1f   :  { %503 = vmatpush3.bf16.msra.mxu1 %v500_v23  ;;  %531 = vmatpush3.bf16.msra.mxu0 %v528_v44 }
  0x20   :  { %505 = vmatprep.subr.bf16.mxu1 %v504_v26  ;;  %533 = vmatprep.subr.bf16.mxu0 %v532_v57 }
  0x23   :  { %507 = vmatpush3.bf16.msra.mxu1 %v504_v26  ;;  %535 = vmatpush3.bf16.msra.mxu0 %v532_v57 }
  0x24   :  { %537 = vmatprep.subr.bf16.mxu0 %v536_v60 }
  0x27   :  { %539 = vmatpush3.bf16.msra.mxu0 %v536_v60 }
  0xd7   :  { %v405_v46 = vpop.f32.mrb[0].mxu0 }
  0xd8   :  { %v125_v48 = vmul.f32 %v405_v46, %v357_v45  ;;  %v108_v49 = vpop.f32.mrb[1].mxu0 }
  0xd9   :  { %v124_v50 = vmul.f32 %v357_v45, %v108_v49 }
  0xda   :  { %v134_v51 = vadd.f32 %v358_v47, %v125_v48 }
  0xdb   :  { %v133_v52 = vadd.f32 %v358_v47, %v124_v50 }
  0xdc   :  { %v136_v54 = vmax.f32 %v134_v51, 0.0 }
  0xdd   :  { %v135_v53 = vmax.f32 %v133_v52, 0.0 }
  0xdf   :  { %438 = vmatprep.mubr.f32.mxu1 %v135_v53 }
  0xe0   :  { %439 = vmatmul.mubr.f32.vlgmr.msra.gmra.mrb[0].mxu1 %v136_v54 }
 0x1b3   :  { %v440_v62 = vpop.f32.mrb[0].mxu1 }
 0x1b4   :  { %v236_v0 = vmul.f32 %v440_v62, %v359_v61  ;;  %v219_v1 = vpop.f32.mrb[1].mxu1 }
 0x1b5   :  { %v235_v2 = vmul.f32 %v359_v61, %v219_v1 }
 0x1b6   :  { %v245_v3 = vadd.f32 %v360_v63, %v236_v0 }
 0x1b7   :  { %v244_v4 = vadd.f32 %v360_v63, %v235_v2 }
 0x1b8   :  { %v247_v6 = vmax.f32 %v245_v3, 0.0 }
 0x1b9   :  { %v246_v5 = vmax.f32 %v244_v4, 0.0 }
 0x1bb   :  { %473 = vmatprep.mubr.f32.mxu0 %v246_v5 }
 0x1bc   :  { %474 = vmatmul.mubr.f32.vlgmr.msra.gmra.mrb[2].mxu0 %v247_v6 }
 0x28f   :  { %v475_v8 = vpop.f32.mrb[2].mxu0 }
 0x290   :  { %v343_v9 = vadd.f32 %v475_v8, %v361_v7  ;;  %v337_v10 = vpop.f32.mrb[3].mxu0 }
 0x291   :  { %v338_v11 = vadd.f32 %v361_v7, %v337_v10 }
 0x292   :  { %540 = vtanh.f32 %v343_v9 }
 0x293   :  { %542 = vtanh.f32 %v338_v11 }
 0x29c   :  { %v541_v12 = vpop.eup %540 }
 0x29d   :  { %v543_v13 = vpop.eup %542  ;;  %350 = vst.msk [vmem:[%s729_s9 + $0x8] sm:$0xff] %vm348_vm1, %v541_v12 }
 0x29e   :  { %349 = vst.msk [vmem:[%s729_s9] sm:$0xff] %vm348_vm1, %v543_v13 }

</bundles_post_ra>
